<compile_context>
chip_gen: v5e
topology: v5e:2x2
jax: 0.10.0
libtpu: 0.0.40
codegen_flags: <defaults>
</compile_context>

<pallas_src>
import functools

import jax
import jax.numpy as jnp
from jax.experimental import pallas as pl
from jax.experimental.pallas import tpu as pltpu

_OUT_PAD = 128  # lane-dense padded logits width; true logits live in [:, :2]


def _kgbertsage_head_kernel(emb_self_ref, emb_nb_ref, inv_cnt_ref,
                            w_self_ref, w_nb_ref, b_ref, out_ref,
                            *, num_neighbour, hidden):
    # emb_self_ref: (Bt, H)        emb dtype
    # emb_nb_ref:   (Bt, N*H)      emb dtype (lane-dense 2-D layout)
    # inv_cnt_ref:  (Bt, 1)  f32   (1 / neighbour count per row)
    # w_self_ref:   (H, 128)       emb dtype
    # w_nb_ref:     (H, 128)       emb dtype
    # b_ref:        (1, 128) f32
    w_nb = w_nb_ref[...]

    # Neighbour sum folded into the MXU: one dot per neighbour slice,
    # accumulated in f32.  Static Python loop (N is small and static).
    acc_nb = jnp.dot(emb_nb_ref[:, 0:hidden], w_nb,
                     preferred_element_type=jnp.float32)
    for n in range(1, num_neighbour):
        acc_nb += jnp.dot(emb_nb_ref[:, n * hidden:(n + 1) * hidden], w_nb,
                          preferred_element_type=jnp.float32)

    logits = (
        jnp.dot(emb_self_ref[...], w_self_ref[...],
                preferred_element_type=jnp.float32)
        + acc_nb * inv_cnt_ref[...]          # (Bt,128) * (Bt,1) row scale
        + b_ref[...]
    )
    out_ref[...] = logits.astype(out_ref.dtype)


def _choose_block_b(B, N, H, emb_itemsize, block_b, vmem_budget_bytes):
    """Pick the batch-tile size from a VMEM budget; prefer >= 2 grid steps."""
    bt = B if B <= block_b else block_b
    if bt <= 8:
        return bt
    # Double-buffered streamed bytes per batch row (inputs + padded output).
    row_bytes = 2 * ((N + 1) * H * emb_itemsize + (_OUT_PAD + 1) * 4)
    cap = max(8, (vmem_budget_bytes // row_bytes) // 8 * 8)
    bt = max(8, min(bt, cap) // 8 * 8)
    # Split into at least 2 grid steps so the "parallel" batch axis can be
    # sharded across v7x's 2 TensorCores (and so the pipeline has >1 step).
    if bt >= B and B >= 16:
        bt = max(8, ((pl.cdiv(B, 2) + 7) // 8) * 8)
    return bt


def kgbertsage_head(emb_self, emb_nb, weight, bias, nb_counts=None,
                    *, block_b=1024, vmem_budget_bytes=24 << 20):
    """Classifier head of KGBERTSAGEClassifier.

    emb_self: (B, H)  [CLS] embedding of the (possibly poisoned) triple.
    emb_nb:   (B, N, H) neighbour [CLS] embeddings (zero-padded if a sample
              has fewer than N neighbours).
    weight:   (2, 2H) nn.Linear weight.   bias: (2,).
    nb_counts: optional (B,) valid-neighbour counts (defaults to N for all).
    Returns logits (B, 2).
    """
    B, H = emb_self.shape
    _, N, Hn = emb_nb.shape
    assert Hn == H and weight.shape == (2, 2 * H)

    emb_dtype = emb_self.dtype
    itemsize = jnp.dtype(emb_dtype).itemsize

    # Split the Linear weight for the concat and pad columns to 128
    # (lane-dense output); cast the tiny weights to the embedding dtype so the
    # MXU sees a matched-dtype single-pass matmul.  Bias / accumulation in f32.
    w_self = jnp.zeros((H, _OUT_PAD), jnp.float32)
    w_self = w_self.at[:, :2].set(weight[:, :H].astype(jnp.float32).T)
    w_nb = jnp.zeros((H, _OUT_PAD), jnp.float32)
    w_nb = w_nb.at[:, :2].set(weight[:, H:].astype(jnp.float32).T)
    w_self = w_self.astype(emb_dtype)
    w_nb = w_nb.astype(emb_nb.dtype)
    b_pad = jnp.zeros((1, _OUT_PAD), jnp.float32)
    b_pad = b_pad.at[0, :2].set(bias.astype(jnp.float32))

    # Per-row 1/count for the neighbour mean (torch: mean over the actual
    # sampled neighbours).  Defaults to 1/N.
    if nb_counts is None:
        inv_cnt = jnp.full((B, 1), 1.0 / N, jnp.float32)
    else:
        inv_cnt = (1.0 / jnp.maximum(nb_counts.astype(jnp.float32), 1.0)
                   ).reshape(B, 1)

    # Free, contiguous row-major reshape -> lane-dense 2-D neighbour stream.
    emb_nb_2d = emb_nb.reshape(B, N * H)

    bt = _choose_block_b(B, N, H, itemsize, block_b, vmem_budget_bytes)
    grid = (pl.cdiv(B, bt),)

    grid_spec = pl.GridSpec(
        grid=grid,
        in_specs=[
            pl.BlockSpec((bt, H), lambda i: (i, 0)),
            pl.BlockSpec((bt, N * H), lambda i: (i, 0)),
            pl.BlockSpec((bt, 1), lambda i: (i, 0)),
            pl.BlockSpec((H, _OUT_PAD), lambda i: (0, 0)),
            pl.BlockSpec((H, _OUT_PAD), lambda i: (0, 0)),
            pl.BlockSpec((1, _OUT_PAD), lambda i: (0, 0)),
        ],
        out_specs=pl.BlockSpec((bt, _OUT_PAD), lambda i: (i, 0)),
    )

    cost = pl.CostEstimate(
        flops=2 * B * H * _OUT_PAD * (N + 1),           # (N+1) (Bt,H)x(H,128) dots
        transcendentals=0,
        bytes_accessed=(B * (N + 1) * H * itemsize      # embeddings in
                        + B * 4                         # inv counts
                        + 2 * H * _OUT_PAD * itemsize   # split weights
                        + _OUT_PAD * 4                  # bias
                        + B * _OUT_PAD * 4),            # padded logits out
    )

    kernel = functools.partial(_kgbertsage_head_kernel,
                               num_neighbour=N, hidden=H)

    out_pad = pl.pallas_call(
        kernel,
        out_shape=jax.ShapeDtypeStruct((B, _OUT_PAD), jnp.float32),
        grid_spec=grid_spec,
        compiler_params=pltpu.CompilerParams(
            dimension_semantics=("parallel",),
            vmem_limit_bytes=32 << 20),
        cost_estimate=cost,
    )(emb_self, emb_nb_2d, inv_cnt, w_self, w_nb, b_pad)

    return out_pad[:, :2]


if __name__ == "__main__":
    # Small shapes: batch=2, num_neighbour=4, hidden (emb_size)=32.
    B, N, H = 2, 4, 32
    key = jax.random.PRNGKey(0)
    k1, k2, k3, k4 = jax.random.split(key, 4)

    # Deterministic stand-ins for the LM [CLS] embeddings.
    emb_self = jax.random.normal(k1, (B, H), dtype=jnp.float32)
    emb_nb = jax.random.normal(k2, (B, N, H), dtype=jnp.float32)

    # Deterministic init of the classifier head: nn.Linear(emb_size*2, 2).
    weight = jax.random.normal(k3, (2, 2 * H), dtype=jnp.float32) * 0.02
    bias = jax.random.normal(k4, (2,), dtype=jnp.float32) * 0.02

    # --- Case 1: every sample has exactly N neighbours (matches torch when
    # the neighbour list length >= num_neighbour). ---
    logits = kgbertsage_head(emb_self, emb_nb, weight, bias)
    jax.block_until_ready(logits)

    emb_cat = jnp.concatenate([emb_self, jnp.mean(emb_nb, axis=1)], axis=1)
    ref = emb_cat @ weight.T + bias
    assert logits.shape == (B, 2)
    assert jnp.allclose(logits, ref, atol=1e-2, rtol=1e-2), (
        jnp.max(jnp.abs(logits - ref)))

    # --- Case 2: variable neighbour counts (zero-padded slots + per-row
    # reciprocal count), matching torch's mean over the sampled neighbours. ---
    counts = jnp.array([3, 4], dtype=jnp.int32)
    mask = (jnp.arange(N)[None, :] < counts[:, None]).astype(jnp.float32)
    emb_nb_var = emb_nb * mask[:, :, None]
    logits_var = kgbertsage_head(emb_self, emb_nb_var, weight, bias,
                                 nb_counts=counts)
    jax.block_until_ready(logits_var)

    nb_mean_ref = (jnp.sum(emb_nb_var, axis=1)
                   / counts[:, None].astype(jnp.float32))
    ref_var = jnp.concatenate([emb_self, nb_mean_ref], axis=1) @ weight.T + bias
    assert jnp.allclose(logits_var, ref_var, atol=1e-2, rtol=1e-2), (
        jnp.max(jnp.abs(logits_var - ref_var)))

    print("KERNEL_OK")
</pallas_src>

<mosaic_0001>
module attributes {stable_mosaic.version = 11 : i64} {
  func.func @_kgbertsage_head_kernel(%arg0: i32, %arg1: memref<2x32xf32, #tpu.memory_space<vmem>>, %arg2: memref<2x128xf32, #tpu.memory_space<vmem>>, %arg3: memref<2x1xf32, #tpu.memory_space<vmem>>, %arg4: memref<32x128xf32, #tpu.memory_space<vmem>>, %arg5: memref<32x128xf32, #tpu.memory_space<vmem>>, %arg6: memref<1x128xf32, #tpu.memory_space<vmem>>, %arg7: memref<2x128xf32, #tpu.memory_space<vmem>>) attributes {dimension_semantics = [#tpu.dimension_semantics<parallel>], iteration_bounds = array<i64: 1>, scalar_prefetch = 0 : i64, scratch_operands = 0 : i64, tpu.core_type = #tpu.core_type<tc>, window_params = [{transform_indices = @transform_0, window_bounds = array<i64: 2, 32>}, {transform_indices = @transform_1, window_bounds = array<i64: 2, 128>}, {transform_indices = @transform_2, window_bounds = array<i64: 2, 1>}, {pipeline_mode = #tpu.pipeline_mode<synchronous>, transform_indices = @transform_3, window_bounds = array<i64: 32, 128>}, {pipeline_mode = #tpu.pipeline_mode<synchronous>, transform_indices = @transform_4, window_bounds = array<i64: 32, 128>}, {pipeline_mode = #tpu.pipeline_mode<synchronous>, transform_indices = @transform_5, window_bounds = array<i64: 1, 128>}, {transform_indices = @transform_6, window_bounds = array<i64: 2, 128>}]} {
    %c0 = arith.constant 0 : index
    %c0_0 = arith.constant 0 : index
    %0 = vector.load %arg5[%c0, %c0_0] : memref<32x128xf32, #tpu.memory_space<vmem>>, vector<32x128xf32>
    %c0_1 = arith.constant 0 : index
    %c0_2 = arith.constant 0 : index
    %1 = vector.load %arg2[%c0_1, %c0_2] : memref<2x128xf32, #tpu.memory_space<vmem>>, vector<2x32xf32>
    %cst = arith.constant dense<0.000000e+00> : vector<2x128xf32>
    %2 = tpu.matmul %1, %0, %cst {dimension_numbers = #tpu.dot_dimension_numbers<[1], [0], [0], [1], [0, 0, 1, 1], [], []>} : vector<2x32xf32>, vector<32x128xf32>, vector<2x128xf32> -> vector<2x128xf32>
    %c0_3 = arith.constant 0 : index
    %c32 = arith.constant 32 : index
    %3 = vector.load %arg2[%c0_3, %c32] : memref<2x128xf32, #tpu.memory_space<vmem>>, vector<2x32xf32>
    %cst_4 = arith.constant dense<0.000000e+00> : vector<2x128xf32>
    %4 = tpu.matmul %3, %0, %cst_4 {dimension_numbers = #tpu.dot_dimension_numbers<[1], [0], [0], [1], [0, 0, 1, 1], [], []>} : vector<2x32xf32>, vector<32x128xf32>, vector<2x128xf32> -> vector<2x128xf32>
    %5 = arith.addf %2, %4 : vector<2x128xf32>
    %c0_5 = arith.constant 0 : index
    %c64 = arith.constant 64 : index
    %6 = vector.load %arg2[%c0_5, %c64] : memref<2x128xf32, #tpu.memory_space<vmem>>, vector<2x32xf32>
    %cst_6 = arith.constant dense<0.000000e+00> : vector<2x128xf32>
    %7 = tpu.matmul %6, %0, %cst_6 {dimension_numbers = #tpu.dot_dimension_numbers<[1], [0], [0], [1], [0, 0, 1, 1], [], []>} : vector<2x32xf32>, vector<32x128xf32>, vector<2x128xf32> -> vector<2x128xf32>
    %8 = arith.addf %5, %7 : vector<2x128xf32>
    %c0_7 = arith.constant 0 : index
    %c96 = arith.constant 96 : index
    %9 = vector.load %arg2[%c0_7, %c96] : memref<2x128xf32, #tpu.memory_space<vmem>>, vector<2x32xf32>
    %cst_8 = arith.constant dense<0.000000e+00> : vector<2x128xf32>
    %10 = tpu.matmul %9, %0, %cst_8 {dimension_numbers = #tpu.dot_dimension_numbers<[1], [0], [0], [1], [0, 0, 1, 1], [], []>} : vector<2x32xf32>, vector<32x128xf32>, vector<2x128xf32> -> vector<2x128xf32>
    %11 = arith.addf %8, %10 : vector<2x128xf32>
    %c0_9 = arith.constant 0 : index
    %c0_10 = arith.constant 0 : index
    %12 = vector.load %arg1[%c0_9, %c0_10] : memref<2x32xf32, #tpu.memory_space<vmem>>, vector<2x32xf32>
    %c0_11 = arith.constant 0 : index
    %c0_12 = arith.constant 0 : index
    %13 = vector.load %arg4[%c0_11, %c0_12] : memref<32x128xf32, #tpu.memory_space<vmem>>, vector<32x128xf32>
    %cst_13 = arith.constant dense<0.000000e+00> : vector<2x128xf32>
    %14 = tpu.matmul %12, %13, %cst_13 {dimension_numbers = #tpu.dot_dimension_numbers<[1], [0], [0], [1], [0, 0, 1, 1], [], []>} : vector<2x32xf32>, vector<32x128xf32>, vector<2x128xf32> -> vector<2x128xf32>
    %c0_14 = arith.constant 0 : index
    %c0_15 = arith.constant 0 : index
    %15 = vector.load %arg3[%c0_14, %c0_15] : memref<2x1xf32, #tpu.memory_space<vmem>>, vector<2x1xf32>
    %16 = vector.broadcast %15 : vector<2x1xf32> to vector<2x128xf32>
    %17 = arith.mulf %11, %16 : vector<2x128xf32>
    %18 = arith.addf %14, %17 : vector<2x128xf32>
    %c0_16 = arith.constant 0 : index
    %c0_17 = arith.constant 0 : index
    %19 = vector.load %arg6[%c0_16, %c0_17] : memref<1x128xf32, #tpu.memory_space<vmem>>, vector<1x128xf32>
    %20 = vector.broadcast %19 : vector<1x128xf32> to vector<2x128xf32>
    %21 = arith.addf %18, %20 : vector<2x128xf32>
    %c0_18 = arith.constant 0 : index
    %c0_19 = arith.constant 0 : index
    %22 = vector.load %arg7[%c0_18, %c0_19] : memref<2x128xf32, #tpu.memory_space<vmem>>, vector<2x128xf32>
    tpu.vector_store %arg7[%c0_18, %c0_19], %21 {strides = array<i32>} : memref<2x128xf32, #tpu.memory_space<vmem>>, vector<2x128xf32>,
    return
  }
  func.func @transform_0(%arg0: i32) -> (i32, i32) {
    %c0_i32 = arith.constant 0 : i32
    %c0_i32_0 = arith.constant 0 : i32
    return %arg0, %c0_i32 : i32, i32
  }
  func.func @transform_1(%arg0: i32) -> (i32, i32) {
    %c0_i32 = arith.constant 0 : i32
    %c0_i32_0 = arith.constant 0 : i32
    return %arg0, %c0_i32 : i32, i32
  }
  func.func @transform_2(%arg0: i32) -> (i32, i32) {
    %c0_i32 = arith.constant 0 : i32
    %c0_i32_0 = arith.constant 0 : i32
    return %arg0, %c0_i32 : i32, i32
  }
  func.func @transform_3(%arg0: i32) -> (i32, i32) {
    %c0_i32 = arith.constant 0 : i32
    %c0_i32_0 = arith.constant 0 : i32
    %c0_i32_1 = arith.constant 0 : i32
    return %c0_i32, %c0_i32_0 : i32, i32
  }
  func.func @transform_4(%arg0: i32) -> (i32, i32) {
    %c0_i32 = arith.constant 0 : i32
    %c0_i32_0 = arith.constant 0 : i32
    %c0_i32_1 = arith.constant 0 : i32
    return %c0_i32, %c0_i32_0 : i32, i32
  }
  func.func @transform_5(%arg0: i32) -> (i32, i32) {
    %c0_i32 = arith.constant 0 : i32
    %c0_i32_0 = arith.constant 0 : i32
    %c0_i32_1 = arith.constant 0 : i32
    return %c0_i32, %c0_i32_0 : i32, i32
  }
  func.func @transform_6(%arg0: i32) -> (i32, i32) {
    %c0_i32 = arith.constant 0 : i32
    %c0_i32_0 = arith.constant 0 : i32
    return %arg0, %c0_i32 : i32, i32
  }
}

</mosaic_0001>

<bundles_post_ra>
// kernel: tpu_custom_call.1
= control target key start
LH: loop header
LB: loop body
LE: loop exit
PB: predicated region body
PF: predicated region fallthrough
CT: control target
= control target key end

     0   :  { %11 = vsyncpa [#allocation3], 0  ;;  %s422_s0 = inlined_call_operand.vmem [shape: f32[2,32], index: 0, kind: input, shape index: {}]   ;;  %s423_s1 = inlined_call_operand.hbm [shape: f32[2,128], index: 1, kind: input, shape index: {}]   ;;  %s424_s2 = inlined_call_operand.vmem [shape: f32[2,1], index: 2, kind: input, shape index: {}]   ;;  %s425_s3 = inlined_call_operand.hbm [shape: f32[32,128], index: 3, kind: input, shape index: {}]   ;;  %s426_s4 = inlined_call_operand.hbm [shape: f32[32,128], index: 4, kind: input, shape index: {}]   ;;  %s427_s5 = inlined_call_operand.vmem [shape: f32[1,128], index: 5, kind: input, shape index: {}]   ;;  %s428_s6 = inlined_call_operand.hbm [shape: f32[2,128], index: 6, kind: output, shape index: {}]  }
   0x1   :  { %12 = vsyncpa [#allocation6], 0  ;;  %s33_s23 = sshll.u32 %s425_s3, 4  ;;  %s34_s23 = int_to_ptr.hbm [resolvable:$true] %s33_s23 }
   0x2   :  { %13 = vsyncpa [#allocation4], 0  ;;  %s351_s24 = smov [#allocation5]   ;;  %s21_s28 = sshll.u32 %s423_s1, 4  ;;  %s22_s28 = int_to_ptr.hbm [resolvable:$true] %s21_s28 }
   0x3   :  { %s35_s25 = sshll.u32 %s351_s24, 4  ;;  %s352_s29 = smov 128   ;;  %s36_s25 = int_to_ptr.vmem [resolvable:$true] %s35_s25 }
   0x4   :  { %s353_s30 = smov 8   ;;  %s354_s7 = smov [#allocation2]  }
   0x5   :  { %41 = dma.hbm_to_vmem [thread:$0]  %s34_s23, 512, %s36_s25, [#allocation6], %s352_s29, %s352_s29, %s353_s30  }
   0x6   :  { %s23_s8 = sshll.u32 %s354_s7, 4  ;;  %s46_s11 = sshll.u32 %s426_s4, 4  ;;  %s24_s8 = int_to_ptr.vmem [resolvable:$true] %s23_s8  ;;  %s47_s11 = int_to_ptr.hbm [resolvable:$true] %s46_s11 }
   0x7   :  { %26 = dma.hbm_to_vmem [thread:$0]  %s22_s28, 32, %s24_s8, [#allocation3]  }
   0x8   :  { %s355_s3 = smov [#allocation7]  }
   0x9   :  { %s48_s12 = sshll.u32 %s355_s3, 4  ;;  %s49_s12 = int_to_ptr.vmem [resolvable:$true] %s48_s12 }
   0xa   :  { %54 = dma.hbm_to_vmem [thread:$0]  %s47_s11, 512, %s49_s12, [#allocation6], %s352_s29, %s352_s29, %s353_s30  }
   0xb   :  { %345 = dma.done.wait [#allocation3], 32  }
   0xc   :  { %346 = vsyncadd [#allocation3], 4294967264 }
   0xd   :  { %347 = dma.done.wait [#allocation6], 1024  }
   0xe   :  { %348 = vsyncadd [#allocation6], 4294966272  ;;  %v73_v0 = vld [vmem:[#allocation2] sm:$0x3]  ;;  %s356_s1 = smov 64   ;;  %s357_s13 = smov 96  }
   0xf   :  { %v72_v1 = vld [vmem:[#allocation7 + $0x18] sm:$0xff]  ;;  %122 = vrot.lane.b32.xlu0 %v73_v0, %s356_s1  ;;  %75 = vrot.lane.b32.xlu1 %v73_v0, %s357_s13  ;;  %v71_v2 = vld [vmem:[#allocation7 + $0x10] sm:$0xff]  ;;  %v70_v3 = vld [vmem:[#allocation7 + $0x8] sm:$0xff]  ;;  %s358_s4 = smov 32   ;;  %vm77_vm0 = vcmask 261120   ;;  %v359_v7 = vmov 0  }
  0x10   :  { %138 = vmatpush.msra.mxu2 %v72_v1  ;;  %92 = vmatpush.msra.mxu0 %v72_v1  ;;  %v69_v4 = vld [vmem:[#allocation7] sm:$0xff]  ;;  %v176_v5 = vld [vmem:[#allocation5 + $0x18] sm:$0xff]  ;;  %v175_v6 = vld [vmem:[#allocation5 + $0x10] sm:$0xff]  ;;  %s220_s22 = sshll.u32 %s428_s6, 4  ;;  %s221_s22 = int_to_ptr.hbm [resolvable:$true] %s220_s22 }
  0x11   :  { %114 = vmatpush.msra.mxu1 %v72_v1  ;;  %163 = vmatpush.msra.mxu3 %v72_v1  ;;  %v177_v8 = vld [vmem:[%s424_s2] sm:$0x3]  ;;  %v174_v9 = vld [vmem:[#allocation5 + $0x8] sm:$0xff]  ;;  %v173_v10 = vld [vmem:[#allocation5] sm:$0xff] }
  0x12   :  { %139 = vmatpush.msra.mxu2 %v71_v2  ;;  %93 = vmatpush.msra.mxu0 %v71_v2  ;;  %v172_v13 = vld [vmem:[%s422_s0] sm:$0x3]  ;;  %s360_s0 = smov [#allocation8]  }
  0x13   :  { %115 = vmatpush.msra.mxu1 %v71_v2  ;;  %164 = vmatpush.msra.mxu3 %v71_v2  ;;  %v248_v25 = vld [vmem:[%s427_s5] ss:$0 sm:$0xff]  ;;  %s218_s19 = sshll.u32 %s360_s0, 4  ;;  %s219_s19 = int_to_ptr.vmem [resolvable:$true] %s218_s19 }
  0x14   :  { %140 = vmatpush.msra.mxu2 %v70_v3  ;;  %94 = vmatpush.msra.mxu0 %v70_v3 }
  0x15   :  { %116 = vmatpush.msra.mxu1 %v70_v3  ;;  %165 = vmatpush.msra.mxu3 %v70_v3 }
  0x16   :  { %141 = vmatpush.msra.mxu2 %v69_v4  ;;  %95 = vmatpush.msra.mxu0 %v69_v4 }
  0x17   :  { %147 = vrot.lane.b32.xlu0 %v73_v0, %s358_s4  ;;  %117 = vmatpush.msra.mxu1 %v69_v4 }
  0x18   :  { %166 = vmatpush.msra.mxu3 %v69_v4  ;;  %232 = vmatmul.msk.f32.vlgmr.msra.gmra.mxu1 %vm77_vm0, %v73_v0 }
  0x19   :  { %199 = vmatpush.msrb.mxu0 %v176_v5  ;;  %246 = vset.pattern.permute.xlu1 %v359_v7 }
  0x1a   :  { %180 = vperm.xlu1 %246, %v177_v8   ;;  %247 = vset.pattern.permute.xlu0 %v359_v7 }
  0x1b   :  { %200 = vmatpush.msrb.mxu0 %v175_v6 }
  0x1d   :  { %201 = vmatpush.msrb.mxu0 %v174_v9 }
  0x1f   :  { %202 = vmatpush.msrb.mxu0 %v173_v10 }
  0x81   :  { %v123_v11 = vpop.permute.xlu0 %122  ;;  %v76_v12 = vpop.permute.xlu1 %75 }
  0x82   :  { %233 = vmatmul.msk.f32.vlgmr.msra.gmra.mxu2 %vm77_vm0, %v123_v11  ;;  %231 = vmatmul.msk.f32.vlgmr.msra.gmra.mxu0 %vm77_vm0, %v76_v12 }
  0x89   :  { %v148_v14 = vpop.permute.xlu0 %147 }
  0x8a   :  { %234 = vmatmul.msk.f32.vlgmr.msra.gmra.mxu3 %vm77_vm0, %v148_v14  ;;  %235 = vmatmul.msk.f32.vlgmr.msrb.gmra.mxu0 %vm77_vm0, %v172_v13 }
  0x8c   :  { %v181_v21 = vpop.permute.xlu1 %180 }
  0x95   :  { %v119_v16 = vpop.f32.mrf.mxu1 }
  0xff   :  { %v97_v15 = vpop.f32.mrf.mxu0 }
 0x100   :  { %v120_v17 = vadd.f32 %v119_v16, %v97_v15 }
 0x105   :  { %v143_v18 = vpop.f32.mrf.mxu2 }
 0x106   :  { %v146_v19 = vadd.f32 %v143_v18, %v120_v17 }
 0x107   :  { %v204_v23 = vpop.f32.mrf.mxu0 }
 0x10d   :  { %v168_v20 = vpop.f32.mrf.mxu3 }
 0x10e   :  { %v171_v22 = vadd.f32 %v168_v20, %v146_v19 }
 0x110   :  { %v183_v24 = vmul.f32 %v181_v21, %v171_v22 }
 0x112   :  { %v205_v26 = vadd.f32 %v204_v23, %v183_v24 }
 0x114   :  { %v211_v27 = vadd.f32 %v248_v25, %v205_v26 }
 0x116   :  { %212 = vst [vmem:[#allocation8] sm:$0x3] %v211_v27 }
 0x117   :  { %223 = dma.vmem_to_hbm [thread:$0]  %s219_s19, 32, %s221_s22, [#allocation4]  }
 0x118   :  { %349 = dma.done.wait [#allocation4], 32  }
 0x119   :  { %350 = vsyncadd [#allocation4], 4294967264 }
 0x11a   :  { %228 = vsyncpa [#allocation3], 1 }
 0x11b   :  { %229 = vsyncpa [#allocation6], 1 }
 0x11c   :  { %230 = vsyncpa [#allocation4], 1 }

</bundles_post_ra>
